<compile_context>
chip_gen: v6e
topology: v6e:2x2x1
jax: 0.10.0
libtpu: 0.0.40
codegen_flags: <defaults>
</compile_context>

<pallas_src>
import jax
import jax.numpy as jnp
from jax.experimental import pallas as pl
from jax.experimental.pallas import tpu as pltpu

NEG_SLOPE = 0.01  # PyTorch nn.LeakyReLU default negative_slope


def _leaky_relu(x):
    return jnp.where(x > 0, x, NEG_SLOPE * x)


def deformation_field_kernel(x_ref, w1_ref, b1_ref, w2_ref, b2_ref,
                             w3_ref, b3_ref, o_ref):
    """Fused MLP in batch-on-lanes layout.

    x_ref : [in_dim, tile_n]        (in_dim ~ 2)
    w1    : [hidden, in_dim]   b1 : [hidden, 1]
    w2    : [hidden, hidden]   b2 : [hidden, 1]
    w3    : [in_dim, hidden]   b3 : [in_dim, 1]
    o_ref : [in_dim, tile_n]
    """
    x = x_ref[...].astype(jnp.float32)          # [in_dim, tile_n]
    in_dim = x.shape[0]

    # ---- Layer 1: K = in_dim (tiny) -> VPU broadcast FMAs, skip the MXU.
    w1 = w1_ref[...]                            # [hidden, in_dim]
    acc1 = w1[:, 0:1] * x[0:1, :]               # [hidden,1]*[1,tile_n] -> [hidden,tile_n]
    for k in range(1, in_dim):                  # static unrolled (in_dim is tiny)
        acc1 = acc1 + w1[:, k:k + 1] * x[k:k + 1, :]
    h1 = _leaky_relu(acc1 + b1_ref[...])        # bias [hidden,1] broadcasts on lanes

    # ---- Layer 2: [hidden, hidden] x [hidden, tile_n] on the MXU.
    h2 = jnp.dot(w2_ref[...], h1, preferred_element_type=jnp.float32) + b2_ref[...]
    h2 = _leaky_relu(h2)

    # ---- Layer 3: [in_dim, hidden] x [hidden, tile_n] on the MXU.
    out = jnp.dot(w3_ref[...], h2, preferred_element_type=jnp.float32) + b3_ref[...]
    o_ref[...] = out.astype(o_ref.dtype)


def deformation_field(x, params, *, tile_n=1024):
    """x: [N, input_dim] float32.  params in PyTorch layout: W [out,in], b [out,1]."""
    n, in_dim = x.shape
    hidden = params["w1"].shape[0]
    assert params["w1"].shape == (hidden, in_dim)
    assert params["w2"].shape == (hidden, hidden)
    assert params["w3"].shape == (in_dim, hidden)

    # Batch on the lane axis; pad N up to a multiple of tile_n (no hard assert).
    n_tiles = pl.cdiv(n, tile_n)
    n_pad = n_tiles * tile_n
    xt = x.T                                    # [in_dim, N]
    if n_pad != n:
        xt = jnp.pad(xt, ((0, 0), (0, n_pad - n)))

    def full_block(shape):
        # Small weights/biases: resident full block every grid step.
        return pl.BlockSpec(shape, lambda i: (0, 0))

    weight_bytes = 4 * sum(int(p.size) for p in params.values())
    flops = 2 * n_pad * (in_dim * hidden + hidden * hidden + hidden * in_dim)
    bytes_accessed = 4 * (2 * n_pad * in_dim) + weight_bytes
    cost = pl.CostEstimate(flops=flops, transcendentals=0,
                           bytes_accessed=bytes_accessed)

    out_t = pl.pallas_call(
        deformation_field_kernel,
        out_shape=jax.ShapeDtypeStruct((in_dim, n_pad), x.dtype),
        grid_spec=pltpu.PrefetchScalarGridSpec(
            num_scalar_prefetch=0,
            grid=(n_tiles,),
            in_specs=[
                pl.BlockSpec((in_dim, tile_n), lambda i: (0, i)),   # x tile (lane-dense)
                full_block((hidden, in_dim)),                        # W1
                full_block((hidden, 1)),                             # b1
                full_block((hidden, hidden)),                        # W2
                full_block((hidden, 1)),                             # b2
                full_block((in_dim, hidden)),                        # W3
                full_block((in_dim, 1)),                             # b3
            ],
            out_specs=pl.BlockSpec((in_dim, tile_n), lambda i: (0, i)),
        ),
        compiler_params=pltpu.CompilerParams(
            dimension_semantics=("parallel",)),
        cost_estimate=cost,
    )(xt, params["w1"], params["b1"], params["w2"], params["b2"],
      params["w3"], params["b3"])

    return out_t[:, :n].T                       # back to [N, input_dim]


def init_params(key, input_dim, hidden_dim):
    """PyTorch-Linear-style uniform init, native layout W [out,in], b [out,1]."""
    ks = jax.random.split(key, 6)

    def linear(kw, kb, fan_in, fan_out):
        bound = 1.0 / jnp.sqrt(fan_in)
        w = jax.random.uniform(kw, (fan_out, fan_in), jnp.float32, -bound, bound)
        b = jax.random.uniform(kb, (fan_out, 1), jnp.float32, -bound, bound)
        return w, b

    w1, b1 = linear(ks[0], ks[1], input_dim, hidden_dim)
    w2, b2 = linear(ks[2], ks[3], hidden_dim, hidden_dim)
    w3, b3 = linear(ks[4], ks[5], hidden_dim, input_dim)
    return {"w1": w1, "b1": b1, "w2": w2, "b2": b2, "w3": w3, "b3": b3}


def reference_forward(x, p):
    h1 = _leaky_relu(x @ p["w1"].T + p["b1"].T)
    h2 = _leaky_relu(h1 @ p["w2"].T + p["b2"].T)
    return h2 @ p["w3"].T + p["b3"].T


if __name__ == "__main__":
    input_dim = 2     # deformation field over 2-D coordinates
    hidden_dim = 32
    n_points = 2048   # rows of a flattened coordinate grid (2 grid steps at tile_n=1024)

    key = jax.random.PRNGKey(0)
    k_x, k_p = jax.random.split(key)
    x = jax.random.normal(k_x, (n_points, input_dim), jnp.float32)
    params = init_params(k_p, input_dim, hidden_dim)

    out = deformation_field(x, params, tile_n=1024)
    out = jax.block_until_ready(out)
    ref = reference_forward(x, params)
    assert out.shape == (n_points, input_dim)
    err = float(jnp.max(jnp.abs(out - ref)))
    assert jnp.allclose(out, ref, atol=1e-4, rtol=1e-4), f"max abs err {err}"

    # Ragged N (not a multiple of tile_n) exercises the cdiv + padding path.
    x2 = jax.random.normal(jax.random.PRNGKey(1), (1000, input_dim), jnp.float32)
    out2 = jax.block_until_ready(deformation_field(x2, params, tile_n=1024))
    ref2 = reference_forward(x2, params)
    assert out2.shape == (1000, input_dim)
    assert jnp.allclose(out2, ref2, atol=1e-4, rtol=1e-4)

    print("KERNEL_OK")
</pallas_src>

<mosaic_0001>
module attributes {stable_mosaic.version = 11 : i64} {
  func.func @deformation_field_kernel(%arg0: i32, %arg1: memref<2x1024xf32, #tpu.memory_space<vmem>>, %arg2: memref<32x2xf32, #tpu.memory_space<vmem>>, %arg3: memref<32x1xf32, #tpu.memory_space<vmem>>, %arg4: memref<32x32xf32, #tpu.memory_space<vmem>>, %arg5: memref<32x1xf32, #tpu.memory_space<vmem>>, %arg6: memref<2x32xf32, #tpu.memory_space<vmem>>, %arg7: memref<2x1xf32, #tpu.memory_space<vmem>>, %arg8: memref<2x1024xf32, #tpu.memory_space<vmem>>) attributes {dimension_semantics = [#tpu.dimension_semantics<parallel>], iteration_bounds = array<i64: 2>, scalar_prefetch = 0 : i64, scratch_operands = 0 : i64, tpu.core_type = #tpu.core_type<tc>, window_params = [{transform_indices = @transform_0, window_bounds = array<i64: 2, 1024>}, {pipeline_mode = #tpu.pipeline_mode<synchronous>, transform_indices = @transform_1, window_bounds = array<i64: 32, 2>}, {pipeline_mode = #tpu.pipeline_mode<synchronous>, transform_indices = @transform_2, window_bounds = array<i64: 32, 1>}, {pipeline_mode = #tpu.pipeline_mode<synchronous>, transform_indices = @transform_3, window_bounds = array<i64: 32, 32>}, {pipeline_mode = #tpu.pipeline_mode<synchronous>, transform_indices = @transform_4, window_bounds = array<i64: 32, 1>}, {pipeline_mode = #tpu.pipeline_mode<synchronous>, transform_indices = @transform_5, window_bounds = array<i64: 2, 32>}, {pipeline_mode = #tpu.pipeline_mode<synchronous>, transform_indices = @transform_6, window_bounds = array<i64: 2, 1>}, {transform_indices = @transform_7, window_bounds = array<i64: 2, 1024>}]} {
    %c0 = arith.constant 0 : index
    %c0_0 = arith.constant 0 : index
    %0 = vector.load %arg1[%c0, %c0_0] : memref<2x1024xf32, #tpu.memory_space<vmem>>, vector<2x1024xf32>
    %c0_1 = arith.constant 0 : index
    %c0_2 = arith.constant 0 : index
    %1 = vector.load %arg2[%c0_1, %c0_2] : memref<32x2xf32, #tpu.memory_space<vmem>>, vector<32x2xf32>
    %2 = vector.extract_strided_slice %1 {offsets = [0, 0], sizes = [32, 1], strides = [1, 1]} : vector<32x2xf32> to vector<32x1xf32>
    %3 = vector.extract_strided_slice %0 {offsets = [0, 0], sizes = [1, 1024], strides = [1, 1]} : vector<2x1024xf32> to vector<1x1024xf32>
    %4 = vector.broadcast %2 : vector<32x1xf32> to vector<32x1024xf32>
    %5 = vector.broadcast %3 : vector<1x1024xf32> to vector<32x1024xf32>
    %6 = arith.mulf %4, %5 : vector<32x1024xf32>
    %7 = vector.extract_strided_slice %1 {offsets = [0, 1], sizes = [32, 1], strides = [1, 1]} : vector<32x2xf32> to vector<32x1xf32>
    %8 = vector.extract_strided_slice %0 {offsets = [1, 0], sizes = [1, 1024], strides = [1, 1]} : vector<2x1024xf32> to vector<1x1024xf32>
    %9 = vector.broadcast %7 : vector<32x1xf32> to vector<32x1024xf32>
    %10 = vector.broadcast %8 : vector<1x1024xf32> to vector<32x1024xf32>
    %11 = arith.mulf %9, %10 : vector<32x1024xf32>
    %12 = arith.addf %6, %11 : vector<32x1024xf32>
    %c0_3 = arith.constant 0 : index
    %c0_4 = arith.constant 0 : index
    %13 = vector.load %arg3[%c0_3, %c0_4] : memref<32x1xf32, #tpu.memory_space<vmem>>, vector<32x1xf32>
    %14 = vector.broadcast %13 : vector<32x1xf32> to vector<32x1024xf32>
    %15 = arith.addf %12, %14 : vector<32x1024xf32>
    %cst = arith.constant 0.000000e+00 : f32
    %16 = vector.broadcast %cst : f32 to vector<32x1024xf32>
    %17 = arith.cmpf ogt, %15, %16 : vector<32x1024xf32>
    %cst_5 = arith.constant 0.00999999977 : f32
    %18 = vector.broadcast %cst_5 : f32 to vector<32x1024xf32>
    %19 = arith.mulf %18, %15 : vector<32x1024xf32>
    %20 = arith.select %17, %15, %19 : vector<32x1024xi1>, vector<32x1024xf32>
    %c0_6 = arith.constant 0 : index
    %c0_7 = arith.constant 0 : index
    %21 = vector.load %arg4[%c0_6, %c0_7] : memref<32x32xf32, #tpu.memory_space<vmem>>, vector<32x32xf32>
    %cst_8 = arith.constant dense<0.000000e+00> : vector<32x1024xf32>
    %22 = tpu.matmul %21, %20, %cst_8 {dimension_numbers = #tpu.dot_dimension_numbers<[1], [0], [0], [1], [0, 0, 1, 1], [], []>} : vector<32x32xf32>, vector<32x1024xf32>, vector<32x1024xf32> -> vector<32x1024xf32>
    %c0_9 = arith.constant 0 : index
    %c0_10 = arith.constant 0 : index
    %23 = vector.load %arg5[%c0_9, %c0_10] : memref<32x1xf32, #tpu.memory_space<vmem>>, vector<32x1xf32>
    %24 = vector.broadcast %23 : vector<32x1xf32> to vector<32x1024xf32>
    %25 = arith.addf %22, %24 : vector<32x1024xf32>
    %cst_11 = arith.constant 0.000000e+00 : f32
    %26 = vector.broadcast %cst_11 : f32 to vector<32x1024xf32>
    %27 = arith.cmpf ogt, %25, %26 : vector<32x1024xf32>
    %cst_12 = arith.constant 0.00999999977 : f32
    %28 = vector.broadcast %cst_12 : f32 to vector<32x1024xf32>
    %29 = arith.mulf %28, %25 : vector<32x1024xf32>
    %30 = arith.select %27, %25, %29 : vector<32x1024xi1>, vector<32x1024xf32>
    %c0_13 = arith.constant 0 : index
    %c0_14 = arith.constant 0 : index
    %31 = vector.load %arg6[%c0_13, %c0_14] : memref<2x32xf32, #tpu.memory_space<vmem>>, vector<2x32xf32>
    %cst_15 = arith.constant dense<0.000000e+00> : vector<2x1024xf32>
    %32 = tpu.matmul %31, %30, %cst_15 {dimension_numbers = #tpu.dot_dimension_numbers<[1], [0], [0], [1], [0, 0, 1, 1], [], []>} : vector<2x32xf32>, vector<32x1024xf32>, vector<2x1024xf32> -> vector<2x1024xf32>
    %c0_16 = arith.constant 0 : index
    %c0_17 = arith.constant 0 : index
    %33 = vector.load %arg7[%c0_16, %c0_17] : memref<2x1xf32, #tpu.memory_space<vmem>>, vector<2x1xf32>
    %34 = vector.broadcast %33 : vector<2x1xf32> to vector<2x1024xf32>
    %35 = arith.addf %32, %34 : vector<2x1024xf32>
    %c0_18 = arith.constant 0 : index
    %c0_19 = arith.constant 0 : index
    %36 = vector.load %arg8[%c0_18, %c0_19] : memref<2x1024xf32, #tpu.memory_space<vmem>>, vector<2x1024xf32>
    tpu.vector_store %arg8[%c0_18, %c0_19], %35 {strides = array<i32>} : memref<2x1024xf32, #tpu.memory_space<vmem>>, vector<2x1024xf32>,
    return
  }
  func.func @transform_0(%arg0: i32) -> (i32, i32) {
    %c0_i32 = arith.constant 0 : i32
    %c0_i32_0 = arith.constant 0 : i32
    return %c0_i32, %arg0 : i32, i32
  }
  func.func @transform_1(%arg0: i32) -> (i32, i32) {
    %c0_i32 = arith.constant 0 : i32
    %c0_i32_0 = arith.constant 0 : i32
    %c0_i32_1 = arith.constant 0 : i32
    return %c0_i32, %c0_i32_0 : i32, i32
  }
  func.func @transform_2(%arg0: i32) -> (i32, i32) {
    %c0_i32 = arith.constant 0 : i32
    %c0_i32_0 = arith.constant 0 : i32
    %c0_i32_1 = arith.constant 0 : i32
    return %c0_i32, %c0_i32_0 : i32, i32
  }
  func.func @transform_3(%arg0: i32) -> (i32, i32) {
    %c0_i32 = arith.constant 0 : i32
    %c0_i32_0 = arith.constant 0 : i32
    %c0_i32_1 = arith.constant 0 : i32
    return %c0_i32, %c0_i32_0 : i32, i32
  }
  func.func @transform_4(%arg0: i32) -> (i32, i32) {
    %c0_i32 = arith.constant 0 : i32
    %c0_i32_0 = arith.constant 0 : i32
    %c0_i32_1 = arith.constant 0 : i32
    return %c0_i32, %c0_i32_0 : i32, i32
  }
  func.func @transform_5(%arg0: i32) -> (i32, i32) {
    %c0_i32 = arith.constant 0 : i32
    %c0_i32_0 = arith.constant 0 : i32
    %c0_i32_1 = arith.constant 0 : i32
    return %c0_i32, %c0_i32_0 : i32, i32
  }
  func.func @transform_6(%arg0: i32) -> (i32, i32) {
    %c0_i32 = arith.constant 0 : i32
    %c0_i32_0 = arith.constant 0 : i32
    %c0_i32_1 = arith.constant 0 : i32
    return %c0_i32, %c0_i32_0 : i32, i32
  }
  func.func @transform_7(%arg0: i32) -> (i32, i32) {
    %c0_i32 = arith.constant 0 : i32
    %c0_i32_0 = arith.constant 0 : i32
    return %c0_i32, %arg0 : i32, i32
  }
}

</mosaic_0001>

<bundles_post_ra>
// kernel: tpu_custom_call.1
= control target key start
LH: loop header
LB: loop body
LE: loop exit
PB: predicated region body
PF: predicated region fallthrough
CT: control target
= control target key end

     0   :  { %12 = vsyncpa [#allocation3], 0  ;;  %s2407_s0 = inlined_call_operand.vmem [shape: f32[2,2048], index: 0, kind: input, shape index: {}]   ;;  %s2408_s1 = inlined_call_operand.vmem [shape: f32[32,2], index: 1, kind: input, shape index: {}]   ;;  %s2409_s2 = inlined_call_operand.vmem [shape: f32[32,1], index: 2, kind: input, shape index: {}]   ;;  %s2410_s3 = inlined_call_operand.vmem [shape: f32[32,32], index: 3, kind: input, shape index: {}]   ;;  %s2411_s4 = inlined_call_operand.vmem [shape: f32[32,1], index: 4, kind: input, shape index: {}]   ;;  %s2412_s5 = inlined_call_operand.vmem [shape: f32[2,32], index: 5, kind: input, shape index: {}]   ;;  %s2413_s6 = inlined_call_operand.vmem [shape: f32[2,1], index: 6, kind: input, shape index: {}]   ;;  %s2414_s7 = inlined_call_operand.hbm [shape: f32[2,2048], index: 7, kind: output, shape index: {}]  }
   0x1   :  { %14 = vsyncpa [#allocation3 + $0x1], 0  ;;  %s1813_s24 = smov 0   ;;  %s1815_s25 = smov 0  }
   0x2   :  { %s1817_s26 = smov 0   ;;  %s1819_s27 = smov 0  }
   0x3 LB: > { %s1834_s28 = sadd.s32 4294967295, %s1766_s27   ;;  %s1623_s29 = sadd.s32 4294967294, %s1766_s27   ;;  %s1766_s27 = sphi %s1819_s27, %s2420_s27   ;;  %s1762_s26 = sphi %s1817_s26, %s2419_s26   ;;  %s1758_s25 = sphi %s1815_s25, %s2418_s25   ;;  %s1754_s24 = sphi %s1813_s24, %s2417_s24  }
   0x4   : > { %s1838_s30 = sadd.s32 1, %s1766_s27   ;;  %s179_s8 = sadd.s32 1, %s1762_s26 }
   0x5   : > { %s176_s9 = ssub.s32 %s1766_s27, %s1838_s30  ;;  %p189_p0 = scmp.ne.s32.totalorder %s1762_s26, %s1758_s25 }
   0x6   : > { %p177_p1 = scmp.eq.s32.totalorder %s176_s9, 0  ;;  %p190_p2 = scmp.eq.s32.totalorder %s1834_s28, 1 }
   0x7   : > { %p195_p3 = scmp.ne.s32.totalorder %s1758_s25, %s1754_s24  ;;  %p196_p4 = scmp.eq.s32.totalorder %s1623_s29, 1 }
   0x8   : > { %s1849_s10 = scalar_select %p177_p1, %s1762_s26, %s179_s8  }
   0x9   : > { %p1851_p5 = por %p190_p2, %p189_p0  ;;  %p1855_p6 = por %p196_p4, %p195_p3 }
   0xa   : > { %p1626_p7 = scmp.ge.s32.totalorder %s1766_s27, 1  ;;  %p241_p8 = scmp.lt.s32.totalorder %s1766_s27, 3 }
   0xc   : > { %p242_p9 = pnand %p1626_p7, %p241_p8 }
   0xd   : > { %s1628_s8 = sshll.u32 (!%p242_p9), %s1834_s28, 3  ;;  %s1772_s22 = smov (!%p242_p9), [#allocation2]  }
   0xe   : > { %245 = sbr.rel (%p242_p9) target bundleno = 645 (0x285), region = 48  ;;  %p274_p10 = scmp.lt.s32.totalorder (!%p242_p9), %s1628_s8, 15 }
   0xf   : > { %s1710_s23 = sshll.u32 (!%p242_p9), %s1772_s22, 4  ;;  %s1711_s23 = int_to_ptr.vmem [resolvable:$false] %s1710_s23 }
  0x10   : > { %s1712_s29 = scalar_lea.vmem (!%p242_p9), %s1711_s23, 512 }
  0x13   : > { %v285_v0 = vld [vmem:[%s2408_s1 + $0x18] sm:$0xff]  ;;  %v284_v1 = vld [vmem:[%s2408_s1 + $0x10] sm:$0xff]  ;;  %v1768_v2 = vmov 1   ;;  %v1769_v3 = vmov 0   ;;  %v283_v4 = vld [vmem:[%s2408_s1 + $0x8] sm:$0xff]  ;;  %v1770_v14 = vmov 0.0   ;;  %v308_v16 = vlaneseq }
  0x14   : > { %1699 = vset.pattern.permute.xlu0 %v1768_v2  ;;  %1700 = vset.pattern.permute.xlu1 %v1769_v3  ;;  %v282_v5 = vld [vmem:[%s2408_s1] sm:$0xff]  ;;  %v567_v6 = vld [vmem:[%s2409_s2 + $0x18] sm:$0xff]  ;;  %v565_v7 = vld [vmem:[%s2409_s2 + $0x8] sm:$0xff]  ;;  %s2422_s8 = smov (!%p274_p10, %s1628_s8), 15  ;;  %vm744_vm15 = vcmask 261120  }
  0x15   : > { %425 = vperm.xlu0 %1699, %v285_v0   ;;  %298 = vperm.xlu1 %1700, %v284_v1   ;;  %v723_v8 = vld [vmem:[%s2411_s4 + $0x18] sm:$0xff]  ;;  %v566_v9 = vld [vmem:[%s2409_s2 + $0x10] sm:$0xff]  ;;  %v721_v10 = vld [vmem:[%s2411_s4 + $0x8] sm:$0xff]  ;;  %s1629_s9 = sshll.u32 %s2422_s8, 1  ;;  %v1903_v17 = vshrl.u32 %v308_v16, 7 }
  0x16   : > { %v564_v11 = vld [vmem:[%s2409_s2] sm:$0xff]  ;;  %v722_v13 = vld [vmem:[%s2411_s4 + $0x10] sm:$0xff]  ;;  %821 = vmatprep.mubr.f32.mxu0 %v1770_v14  ;;  %910 = vmatprep.mubr.f32.mxu1 %v1770_v14  ;;  %s277_s15 = scalar_lea.vmem %s2407_s0, %s1629_s9  ;;  %s270_s9 = sand.u32 1, %s1758_s25  }
  0x17   : > { %v1210_v12 = vld [vmem:[%s2413_s6] sm:$0x3]  ;;  %v314_v18 = vsub.s32 2, %v1903_v17  ;;  %v434_v19 = vsub.s32 3, %v1903_v17  ;;  %v322_v20 = vsub.s32 6, %v1903_v17  ;;  %v442_v21 = vsub.s32 7, %v1903_v17 }
  0x18   : > { %v720_v15 = vld [vmem:[%s2411_s4] sm:$0xff]  ;;  %v310_v23 = vsub.s32 0, %v1903_v17  ;;  %v430_v24 = vsub.s32 1, %v1903_v17  ;;  %v318_v25 = vsub.s32 4, %v1903_v17  ;;  %v438_v26 = vsub.s32 5, %v1903_v17  ;;  %v281_v27 = vld [vmem:[%s277_s15 + $0x8] sm:$0xff] }
  0x19   : > { %1701 = vset.pattern.permute.xlu1 %v1768_v2  ;;  %417 = vperm.xlu0 %1699, %v283_v4   ;;  %v280_v22 = vld [vmem:[%s277_s15] sm:$0xff]  ;;  %v331_v36 = vrot.slane %v281_v27, %v314_v18  ;;  %v451_v37 = vrot.slane %v281_v27, %v434_v19  ;;  %v339_v38 = vrot.slane %v281_v27, %v322_v20  ;;  %s1627_s13 = sshll.u32 %s270_s9, 4  ;;  %s1655_s15 = sshll.u32 %s1834_s28, 8 }
  0x1a   : > { %421 = vperm.xlu1 %1701, %v284_v1   ;;  %v315_v28 = vrot.slane %v280_v22, %v314_v18  ;;  %v435_v29 = vrot.slane %v280_v22, %v434_v19  ;;  %v323_v30 = vrot.slane %v280_v22, %v322_v20  ;;  %v443_v31 = vrot.slane %v280_v22, %v442_v21  ;;  %s272_s14 = scalar_lea.vmem [#allocation2], %s1627_s13  ;;  %s1562_s19 = scalar_lea.hbm %s2414_s7, %s1655_s15 }
  0x1b   : > { %v311_v32 = vrot.slane %v280_v22, %v310_v23  ;;  %v431_v33 = vrot.slane %v280_v22, %v430_v24  ;;  %v319_v34 = vrot.slane %v280_v22, %v318_v25  ;;  %v439_v35 = vrot.slane %v280_v22, %v438_v26  ;;  %s1564_s16 = sshll.u32 %s272_s14, 4  ;;  %s1550_s20 = scalar_lea.sflag [#allocation3], %s270_s9  ;;  %s1565_s16 = int_to_ptr.vmem [resolvable:$true] %s1564_s16 }
  0x1c   : > { %v327_v39 = vrot.slane %v281_v27, %v310_v23  ;;  %v459_v40 = vrot.slane %v281_v27, %v442_v21  ;;  %v447_v41 = vrot.slane %v281_v27, %v430_v24  ;;  %v335_v42 = vrot.slane %v281_v27, %v318_v25  ;;  %s1706_s21 = scalar_lea.vmem %s1565_s16, 256  ;;  %p1713_p0 = scmp.lt.s32.totalorder %s1565_s16, %s1711_s23 }
  0x1d   : > { %1703 = vset.pattern.permute.xlu0 %v1769_v3  ;;  %v455_v43 = vrot.slane %v281_v27, %v438_v26  ;;  %v1916_v44 = vrot.slane %v315_v28, %v310_v23  ;;  %v1918_v45 = vrot.slane %v435_v29, %v430_v24  ;;  %v1920_v46 = vrot.slane %v323_v30, %v310_v23  ;;  %p1707_p11 = scmp.ne.s32.totalorder %s1565_s16, %s1706_s21  ;;  %p1714_p1 = scmp.lt.s32.totalorder %s1712_s29, %s1706_s21 }
  0x1e   : > { %1702 = vset.pattern.permute.xlu1 %v1769_v3  ;;  %303 = vperm.xlu0 %1703, %v285_v0   ;;  %v1922_v47 = vrot.slane %v443_v31, %v430_v24  ;;  %v1924_v48 = vrot.slane %v311_v32, %v310_v23  ;;  %v1926_v49 = vrot.slane %v431_v33, %v430_v24 }
  0x1f   : > { %293 = vperm.xlu1 %1702, %v283_v4   ;;  %v1928_v50 = vrot.slane %v319_v34, %v310_v23  ;;  %v1930_v51 = vrot.slane %v439_v35, %v430_v24  ;;  %v1932_v52 = vrot.slane %v331_v36, %v310_v23  ;;  %v1934_v53 = vrot.slane %v451_v37, %v430_v24  ;;  %p1708_p12 = pnand %p1707_p11, %p1851_p5  ;;  %p1715_p2 = por %p1714_p1, %p1713_p0 }
  0x20   : > { %v1936_v54 = vrot.slane %v339_v38, %v310_v23  ;;  %v1938_v55 = vrot.slane %v327_v39, %v310_v23  ;;  %v1940_v58 = vrot.slane %v459_v40, %v430_v24  ;;  %v1942_v59 = vrot.slane %v447_v41, %v430_v24 }
  0x21   : > { %v1944_v60 = vrot.slane %v335_v42, %v310_v23  ;;  %v1946_v61 = vrot.slane %v455_v43, %v430_v24  ;;  %p1709_p13 = pneg %p1708_p12 }
  0x22   : > { %288 = vperm.xlu0 %1703, %v282_v5  }
  0x23   : > { %585 = vperm.xlu1 %1702, %v567_v6   ;;  %p1716_p3 = pnand %p1715_p2, %p1709_p13 }
  0x26   : > { %575 = vperm.xlu0 %1703, %v565_v7  }
  0x27   : > { %1704 = vset.pattern.permute.xlu1 %v1768_v2 }
  0x28   : > { %413 = vperm.xlu1 %1704, %v282_v5  }
  0x2a   : > { %741 = vperm.xlu0 %1703, %v723_v8  }
  0x2c   : > { %1705 = vset.pattern.permute.xlu1 %v1769_v3 }
  0x2d   : > { %580 = vperm.xlu1 %1705, %v566_v9  }
  0x2e   : > { %731 = vperm.xlu0 %1703, %v721_v10  }
  0x31   : > { %570 = vperm.xlu1 %1705, %v564_v11  }
  0x32   : > { %1213 = vperm.xlu0 %1703, %v1210_v12  }
  0x35   : > { %736 = vperm.xlu1 %1705, %v722_v13  }
  0x39   : > { %726 = vperm.xlu1 %1705, %v720_v15  }
  0x90   : > { %v299_v56 = vpop.permute.xlu1 %298  ;;  %v426_v57 = vpop.permute.xlu0 %425 }
  0x91   : > { %v525_v62 = vmul.f32 %v1918_v45, %v426_v57  ;;  %v527_v63 = vmul.f32 %v1922_v47, %v426_v57  ;;  %v524_v0 = vmul.f32 %v1926_v49, %v426_v57  ;;  %v526_v1 = vmul.f32 %v1930_v51, %v426_v57 }
  0x92   : > { %v397_v2 = vmul.f32 %v1916_v44, %v299_v56  ;;  %v399_v3 = vmul.f32 %v1920_v46, %v299_v56  ;;  %v396_v4 = vmul.f32 %v1924_v48, %v299_v56  ;;  %v398_v5 = vmul.f32 %v1928_v50, %v299_v56 }
  0x93   : > { %v1957_v6 = vmul.f32 %v1934_v53, %v426_v57  ;;  %v1960_v7 = vmul.f32 %v1940_v58, %v426_v57  ;;  %v1963_v8 = vmul.f32 %v1942_v59, %v426_v57  ;;  %v1966_v9 = vmul.f32 %v1946_v61, %v426_v57 }
  0x94   : > { %v1968_v10 = vpop.permute.xlu0 %417  ;;  %v401_v11 = vmul.f32 %v1932_v52, %v299_v56  ;;  %v403_v12 = vmul.f32 %v1936_v54, %v299_v56  ;;  %v400_v13 = vmul.f32 %v1938_v55, %v299_v56  ;;  %v402_v15 = vmul.f32 %v1944_v60, %v299_v56 }
  0x95   : > { %v422_v16 = vpop.permute.xlu1 %421  ;;  %v509_v18 = vmul.f32 %v1918_v45, %v1968_v10  ;;  %v511_v19 = vmul.f32 %v1922_v47, %v1968_v10  ;;  %v508_v20 = vmul.f32 %v1926_v49, %v1968_v10  ;;  %v510_v21 = vmul.f32 %v1930_v51, %v1968_v10 }
  0x96   : > { %v517_v22 = vmul.f32 %v1918_v45, %v422_v16  ;;  %v519_v23 = vmul.f32 %v1922_v47, %v422_v16  ;;  %v516_v24 = vmul.f32 %v1926_v49, %v422_v16  ;;  %v518_v25 = vmul.f32 %v1930_v51, %v422_v16 }
  0x97   : > { %v521_v26 = vmul.f32 %v1934_v53, %v422_v16  ;;  %v523_v27 = vmul.f32 %v1940_v58, %v422_v16  ;;  %v520_v28 = vmul.f32 %v1942_v59, %v422_v16  ;;  %v522_v29 = vmul.f32 %v1946_v61, %v422_v16 }
  0x98   : > { %v1990_v30 = vadd.f32 %v517_v22, %v397_v2  ;;  %v1992_v31 = vadd.f32 %v519_v23, %v399_v3  ;;  %v1994_v32 = vadd.f32 %v516_v24, %v396_v4  ;;  %v1996_v33 = vadd.f32 %v518_v25, %v398_v5 }
  0x99   : > { %v304_v34 = vpop.permute.xlu0 %303  ;;  %v1998_v35 = vadd.f32 %v521_v26, %v401_v11  ;;  %v2000_v36 = vadd.f32 %v523_v27, %v403_v12  ;;  %v2002_v37 = vadd.f32 %v520_v28, %v400_v13  ;;  %v2004_v38 = vadd.f32 %v522_v29, %v402_v15 }
  0x9a   : > { %v2006_v39 = vpop.permute.xlu1 %293  ;;  %v405_v40 = vmul.f32 %v1916_v44, %v304_v34  ;;  %v407_v41 = vmul.f32 %v1920_v46, %v304_v34  ;;  %v404_v42 = vmul.f32 %v1924_v48, %v304_v34  ;;  %v406_v43 = vmul.f32 %v1928_v50, %v304_v34 }
  0x9b   : > { %v389_v56 = vmul.f32 %v1916_v44, %v2006_v39  ;;  %v391_v57 = vmul.f32 %v1920_v46, %v2006_v39  ;;  %v388_v2 = vmul.f32 %v1924_v48, %v2006_v39  ;;  %v390_v3 = vmul.f32 %v1928_v50, %v2006_v39 }
  0x9c   : > { %v557_v4 = vadd.f32 %v525_v62, %v405_v40  ;;  %v559_v5 = vadd.f32 %v527_v63, %v407_v41  ;;  %v556_v11 = vadd.f32 %v524_v0, %v404_v42  ;;  %v558_v12 = vadd.f32 %v526_v1, %v406_v43 }
  0x9d   : > { %v2020_v13 = vpop.permute.xlu0 %288  ;;  %v541_v15 = vadd.f32 %v509_v18, %v389_v56  ;;  %v543_v16 = vadd.f32 %v511_v19, %v391_v57  ;;  %v540_v22 = vadd.f32 %v508_v20, %v388_v2  ;;  %v542_v23 = vadd.f32 %v510_v21, %v390_v3 }
  0x9e   : > { %v2022_v24 = vpop.permute.xlu1 %585  ;;  %v381_v25 = vmul.f32 %v1916_v44, %v2020_v13  ;;  %v383_v26 = vmul.f32 %v1920_v46, %v2020_v13  ;;  %v380_v62 = vmul.f32 %v1924_v48, %v2020_v13  ;;  %v2032_v63 = vmul.f32 %v1928_v50, %v2020_v13 }
  0x9f   : > { %v613_v0 = vadd.f32 %v2022_v24, %v557_v4  ;;  %v615_v1 = vadd.f32 %v2022_v24, %v559_v5  ;;  %v612_v18 = vadd.f32 %v2022_v24, %v556_v11  ;;  %v614_v19 = vadd.f32 %v2022_v24, %v558_v12 }
  0xa0   : > { %v2039_v44 = vmul.f32 %v1932_v52, %v304_v34  ;;  %v2042_v46 = vmul.f32 %v1936_v54, %v304_v34  ;;  %v2045_v48 = vmul.f32 %v1938_v55, %v304_v34  ;;  %v2048_v50 = vmul.f32 %v1944_v60, %v304_v34 }
  0xa1   : > { %v2050_v20 = vpop.permute.xlu0 %575  ;;  %vm645_vm0 = vcmp.gt.f32.partialorder %v613_v0, 0.0  ;;  %v677_v21 = vmul.f32 0.01, %v613_v0  ;;  %vm647_vm1 = vcmp.gt.f32.partialorder %v615_v1, 0.0  ;;  %v679_v27 = vmul.f32 0.01, %v615_v1 }
  0xa2   : > { %vm644_vm2 = vcmp.gt.f32.partialorder %v612_v18, 0.0  ;;  %v676_v28 = vmul.f32 0.01, %v612_v18  ;;  %vm646_vm3 = vcmp.gt.f32.partialorder %v614_v19, 0.0  ;;  %v678_v29 = vmul.f32 0.01, %v614_v19 }
  0xa3   : > { %v2052_v40 = vpop.permute.xlu1 %413  ;;  %v709_v41 = vsel %vm645_vm0, %v613_v0, %v677_v21  ;;  %v711_v42 = vsel %vm647_vm1, %v615_v1, %v679_v27  ;;  %v597_v43 = vadd.f32 %v2050_v20, %v541_v15  ;;  %v599_v56 = vadd.f32 %v2050_v20, %v543_v16 }
  0xa4   : > { %781 = vmatprep.subr.mxu0 %v709_v41  ;;  %870 = vmatprep.subr.mxu1 %v711_v42  ;;  %v708_v34 = vsel %vm644_vm2, %v612_v18, %v676_v28  ;;  %v710_v57 = vsel %vm646_vm3, %v614_v19, %v678_v29  ;;  %v596_v2 = vadd.f32 %v2050_v20, %v540_v22 }
  0xa5   : > { %782 = vmatpush1.msra.mxu0 %v708_v34  ;;  %871 = vmatpush1.msra.mxu1 %v710_v57  ;;  %vm629_vm4 = vcmp.gt.f32.partialorder %v597_v43, 0.0  ;;  %v661_v3 = vmul.f32 0.01, %v597_v43  ;;  %vm631_vm5 = vcmp.gt.f32.partialorder %v599_v56, 0.0  ;;  %v663_v4 = vmul.f32 0.01, %v599_v56 }
  0xa6   : > { %vm628_vm6 = vcmp.gt.f32.partialorder %v596_v2, 0.0  ;;  %v660_v5 = vmul.f32 0.01, %v596_v2  ;;  %v598_v11 = vadd.f32 %v2050_v20, %v542_v23  ;;  %v501_v12 = vmul.f32 %v1918_v45, %v2052_v40 }
  0xa7   : > { %v693_v15 = vsel %vm629_vm4, %v597_v43, %v661_v3  ;;  %v695_v16 = vsel %vm631_vm5, %v599_v56, %v663_v4  ;;  %v503_v0 = vmul.f32 %v1922_v47, %v2052_v40  ;;  %v500_v22 = vmul.f32 %v1926_v49, %v2052_v40 }
  0xa8   : > { %v2064_v1 = vpop.permute.xlu1 %580  ;;  %v692_v18 = vsel %vm628_vm6, %v596_v2, %v660_v5  ;;  %vm630_vm7 = vcmp.gt.f32.partialorder %v598_v11, 0.0  ;;  %v662_v19 = vmul.f32 0.01, %v598_v11  ;;  %v533_v21 = vadd.f32 %v501_v12, %v381_v25 }
  0xa9   : > { %v605_v23 = vadd.f32 %v2064_v1, %v1990_v30  ;;  %v607_v45 = vadd.f32 %v2064_v1, %v1992_v31  ;;  %v604_v27 = vadd.f32 %v2064_v1, %v1994_v32  ;;  %v606_v47 = vadd.f32 %v2064_v1, %v1996_v33 }
  0xaa   : > { %v694_v28 = vsel %vm630_vm7, %v598_v11, %v662_v19  ;;  %v535_v49 = vadd.f32 %v503_v0, %v383_v26  ;;  %v532_v29 = vadd.f32 %v500_v22, %v380_v62  ;;  %v502_v41 = vmul.f32 %v1930_v51, %v2052_v40  ;;  %v2087_v0 = vld [vmem:[%s2410_s3] sm:$0xff] }
  0xab   : > { %vm637_vm8 = vcmp.gt.f32.partialorder %v605_v23, 0.0  ;;  %v669_v25 = vmul.f32 0.01, %v605_v23  ;;  %vm639_vm9 = vcmp.gt.f32.partialorder %v607_v45, 0.0  ;;  %v671_v42 = vmul.f32 0.01, %v607_v45 }
  0xac   : > { %v2076_v30 = vpop.permute.xlu1 %570  ;;  %vm636_vm10 = vcmp.gt.f32.partialorder %v604_v27, 0.0  ;;  %v668_v31 = vmul.f32 0.01, %v604_v27  ;;  %vm638_vm11 = vcmp.gt.f32.partialorder %v606_v47, 0.0  ;;  %v670_v43 = vmul.f32 0.01, %v606_v47 }
  0xad   : > { %v701_v32 = vsel %vm637_vm8, %v605_v23, %v669_v25  ;;  %v703_v56 = vsel %vm639_vm9, %v607_v45, %v671_v42  ;;  %v589_v33 = vadd.f32 %v2076_v30, %v533_v21  ;;  %v591_v26 = vadd.f32 %v2076_v30, %v535_v49 }
  0xae   : > { %783 = vmatprep.subr.mxu0 %v701_v32  ;;  %872 = vmatprep.subr.mxu1 %v703_v56  ;;  %v700_v62 = vsel %vm636_vm10, %v604_v27, %v668_v31  ;;  %v702_v51 = vsel %vm638_vm11, %v606_v47, %v670_v43  ;;  %v588_v34 = vadd.f32 %v2076_v30, %v532_v29 }
  0xaf   : > { %784 = vmatpush1.msra.mxu0 %v700_v62  ;;  %873 = vmatpush1.msra.mxu1 %v702_v51  ;;  %vm621_vm12 = vcmp.gt.f32.partialorder %v589_v33, 0.0  ;;  %v653_v57 = vmul.f32 0.01, %v589_v33  ;;  %vm623_vm13 = vcmp.gt.f32.partialorder %v591_v26, 0.0  ;;  %v655_v2 = vmul.f32 0.01, %v591_v26 }
  0xb0   : > { %785 = vmatprep.subr.mxu0 %v693_v15  ;;  %874 = vmatprep.subr.mxu1 %v695_v16  ;;  %vm620_vm14 = vcmp.gt.f32.partialorder %v588_v34, 0.0  ;;  %v652_v3 = vmul.f32 0.01, %v588_v34  ;;  %v534_v4 = vadd.f32 %v502_v41, %v2032_v63  ;;  %v561_v5 = vadd.f32 %v1957_v6, %v2039_v44 }
  0xb1   : > { %786 = vmatpush1.msra.mxu0 %v692_v18  ;;  %875 = vmatpush1.msra.mxu1 %v694_v28  ;;  %v685_v11 = vsel %vm621_vm12, %v589_v33, %v653_v57  ;;  %v687_v12 = vsel %vm623_vm13, %v591_v26, %v655_v2  ;;  %v563_v15 = vadd.f32 %v1960_v7, %v2042_v46 }
  0xb2   : > { %787 = vmatprep.subr.mxu0 %v685_v11  ;;  %876 = vmatprep.subr.mxu1 %v687_v12  ;;  %v684_v16 = vsel %vm620_vm14, %v588_v34, %v652_v3  ;;  %v590_v63 = vadd.f32 %v2076_v30, %v534_v4  ;;  %v617_v6 = vadd.f32 %v2022_v24, %v561_v5  ;;  %v2139_v34 = vld [vmem:[%s2410_s3 + $0x10] sm:$0xff] }
  0xb3   : > { %788 = vmatpush1.msra.mxu0 %v684_v16  ;;  %v619_v44 = vadd.f32 %v2022_v24, %v563_v15  ;;  %v560_v22 = vadd.f32 %v1963_v8, %v2045_v48  ;;  %v562_v18 = vadd.f32 %v1966_v9, %v2048_v50  ;;  %v609_v19 = vadd.f32 %v2064_v1, %v1998_v35  ;;  %v2108_v35 = vld [vmem:[%s2410_s3 + $0x8] sm:$0xff] }
  0xb4   : > { %vm622_vm0 = vcmp.gt.f32.partialorder %v590_v63, 0.0  ;;  %v654_v7 = vmul.f32 0.01, %v590_v63  ;;  %1630 = vmatmul.mubr.msk.f32.vlgmr.msra.gmra.mxu0 %vm744_vm15, %v2087_v0  ;;  %vm649_vm1 = vcmp.gt.f32.partialorder %v617_v6, 0.0  ;;  %v681_v46 = vmul.f32 0.01, %v617_v6 }
  0xb5   : > { %vm651_vm2 = vcmp.gt.f32.partialorder %v619_v44, 0.0  ;;  %v683_v21 = vmul.f32 0.01, %v619_v44  ;;  %v616_v23 = vadd.f32 %v2022_v24, %v560_v22  ;;  %v618_v45 = vadd.f32 %v2022_v24, %v562_v18  ;;  %827 = vmatprep.mubr.f32.mxu0 %v1770_v14 }
  0xb6   : > { %v686_v8 = vsel %vm622_vm0, %v590_v63, %v654_v7  ;;  %v713_v9 = vsel %vm649_vm1, %v617_v6, %v681_v46  ;;  %vm641_vm3 = vcmp.gt.f32.partialorder %v609_v19, 0.0  ;;  %v673_v48 = vmul.f32 0.01, %v609_v19 }
  0xb7   : > { %877 = vmatpush1.msra.mxu1 %v686_v8  ;;  %959 = vmatprep.subr.mxu0 %v713_v9  ;;  %v715_v50 = vsel %vm651_vm2, %v619_v44, %v683_v21  ;;  %vm648_vm4 = vcmp.gt.f32.partialorder %v616_v23, 0.0  ;;  %v680_v27 = vmul.f32 0.01, %v616_v23  ;;  %vm650_vm5 = vcmp.gt.f32.partialorder %v618_v45, 0.0 }
  0xb8   : > { %1634 = vmatmul.mubr.msk.f32.vlgmr.msra.gmra.mxu1 %vm744_vm15, %v2087_v0  ;;  %1048 = vmatprep.subr.mxu1 %v715_v50  ;;  %v682_v24 = vmul.f32 0.01, %v618_v45  ;;  %v705_v47 = vsel %vm641_vm3, %v609_v19, %v673_v48  ;;  %v611_v28 = vadd.f32 %v2064_v1, %v2000_v36  ;;  %v608_v49 = vadd.f32 %v2064_v1, %v2002_v37 }
  0xb9   : > { %v712_v29 = vsel %vm648_vm4, %v616_v23, %v680_v27  ;;  %916 = vmatprep.mubr.f32.mxu1 %v1770_v14  ;;  %v610_v41 = vadd.f32 %v2064_v1, %v2004_v38  ;;  %1631 = vmatmul.mubr.msk.f32.gmra.mxu0 %vm744_vm15, %v2108_v35  ;;  %v393_v25 = vmul.f32 %v1932_v52, %v2006_v39 }
  0xba   : > { %960 = vmatpush1.msra.mxu0 %v712_v29  ;;  %v714_v42 = vsel %vm650_vm5, %v618_v45, %v682_v24  ;;  %vm643_vm6 = vcmp.gt.f32.partialorder %v611_v28, 0.0  ;;  %v675_v31 = vmul.f32 0.01, %v611_v28  ;;  %vm640_vm7 = vcmp.gt.f32.partialorder %v608_v49, 0.0  ;;  %833 = vmatprep.mubr.f32.mxu0 %v1770_v14 }
  0xbb   : > { %1049 = vmatpush1.msra.mxu1 %v714_v42  ;;  %961 = vmatprep.subr.mxu0 %v705_v47  ;;  %v672_v36 = vmul.f32 0.01, %v608_v49  ;;  %vm642_vm8 = vcmp.gt.f32.partialorder %v610_v41, 0.0  ;;  %v674_v37 = vmul.f32 0.01, %v610_v41  ;;  %v513_v38 = vmul.f32 %v1934_v53, %v1968_v10 }
  0xbc   : > { %v707_v1 = vsel %vm643_vm6, %v611_v28, %v675_v31  ;;  %1635 = vmatmul.mubr.msk.f32.gmra.mxu1 %vm744_vm15, %v2108_v35  ;;  %v395_v43 = vmul.f32 %v1936_v54, %v2006_v39  ;;  %v515_v32 = vmul.f32 %v1940_v58, %v1968_v10  ;;  %v392_v56 = vmul.f32 %v1938_v55, %v2006_v39 }
  0xbd   : > { %1050 = vmatprep.subr.mxu1 %v707_v1  ;;  %v704_v33 = vsel %vm640_vm7, %v608_v49, %v672_v36  ;;  %v706_v26 = vsel %vm642_vm8, %v610_v41, %v674_v37  ;;  %v545_v62 = vadd.f32 %v513_v38, %v393_v25  ;;  %v512_v51 = vmul.f32 %v1942_v59, %v1968_v10 }
  0xbe   : > { %962 = vmatpush1.msra.mxu0 %v704_v33  ;;  %1051 = vmatpush1.msra.mxu1 %v706_v26  ;;  %v547_v57 = vadd.f32 %v515_v32, %v395_v43  ;;  %v394_v2 = vmul.f32 %v1944_v60, %v2006_v39  ;;  %v514_v3 = vmul.f32 %v1946_v61, %v1968_v10 }
  0xbf   : > { %v601_v4 = vadd.f32 %v2050_v20, %v545_v62  ;;  %v544_v5 = vadd.f32 %v512_v51, %v392_v56  ;;  %v385_v11 = vmul.f32 %v1932_v52, %v2020_v13  ;;  %v505_v12 = vmul.f32 %v1934_v53, %v2052_v40  ;;  %922 = vmatprep.mubr.f32.mxu1 %v1770_v14  ;;  %v719_v53 = vld [vmem:[%s2410_s3 + $0x18] sm:$0xff] }
  0xc0   : > { %v603_v15 = vadd.f32 %v2050_v20, %v547_v57  ;;  %v546_v16 = vadd.f32 %v514_v3, %v394_v2  ;;  %v387_v39 = vmul.f32 %v1936_v54, %v2020_v13  ;;  %v507_v10 = vmul.f32 %v1940_v58, %v2052_v40  ;;  %1632 = vmatmul.mubr.msk.f32.gmra.mxu0 %vm744_vm15, %v2139_v34 }
  0xc1   : > { %vm633_vm9 = vcmp.gt.f32.partialorder %v601_v4, 0.0  ;;  %v665_v63 = vmul.f32 0.01, %v601_v4  ;;  %v600_v52 = vadd.f32 %v2050_v20, %v544_v5  ;;  %v537_v6 = vadd.f32 %v505_v12, %v385_v11  ;;  %1636 = vmatmul.mubr.msk.f32.gmra.mxu1 %vm744_vm15, %v2139_v34  ;;  %839 = vmatprep.mubr.f32.mxu0 %v1770_v14 }
  0xc2   : > { %vm635_vm10 = vcmp.gt.f32.partialorder %v603_v15, 0.0  ;;  %v667_v54 = vmul.f32 0.01, %v603_v15  ;;  %v602_v58 = vadd.f32 %v2050_v20, %v546_v16  ;;  %v539_v44 = vadd.f32 %v507_v10, %v387_v39  ;;  %928 = vmatprep.mubr.f32.mxu1 %v1770_v14 }
  0xc3   : > { %v697_v22 = vsel %vm633_vm9, %v601_v4, %v665_v63  ;;  %vm632_vm11 = vcmp.gt.f32.partialorder %v600_v52, 0.0  ;;  %v664_v18 = vmul.f32 0.01, %v600_v52  ;;  %v593_v19 = vadd.f32 %v2076_v30, %v537_v6 }
  0xc4   : > { %963 = vmatprep.subr.mxu0 %v697_v22  ;;  %v699_v7 = vsel %vm635_vm10, %v603_v15, %v667_v54  ;;  %vm634_vm12 = vcmp.gt.f32.partialorder %v602_v58, 0.0  ;;  %v666_v46 = vmul.f32 0.01, %v602_v58  ;;  %v595_v21 = vadd.f32 %v2076_v30, %v539_v44  ;;  %1633 = vmatmul.mubr.msk.f32.gmra.mxu0 %vm744_vm15, %v719_v53 }
  0xc5   : > { %1052 = vmatprep.subr.mxu1 %v699_v7  ;;  %v696_v23 = vsel %vm632_vm11, %v600_v52, %v664_v18  ;;  %vm625_vm13 = vcmp.gt.f32.partialorder %v593_v19, 0.0  ;;  %v657_v20 = vmul.f32 0.01, %v593_v19  ;;  %v384_v45 = vmul.f32 %v1938_v55, %v2020_v13  ;;  %1637 = vmatmul.mubr.msk.f32.gmra.mxu1 %vm744_vm15, %v719_v53 }
  0xc6   : > { %964 = vmatpush1.msra.mxu0 %v696_v23  ;;  %v698_v8 = vsel %vm634_vm12, %v602_v58, %v666_v46  ;;  %vm627_vm14 = vcmp.gt.f32.partialorder %v595_v21, 0.0  ;;  %v659_v9 = vmul.f32 0.01, %v595_v21  ;;  %v504_v48 = vmul.f32 %v1942_v59, %v2052_v40  ;;  %999 = vmatprep.mubr.f32.mxu0 %v1770_v14 }
  0xc7   : > { %1053 = vmatpush1.msra.mxu1 %v698_v8  ;;  %v689_v50 = vsel %vm625_vm13, %v593_v19, %v657_v20  ;;  %v386_v27 = vmul.f32 %v1944_v60, %v2020_v13  ;;  %v506_v24 = vmul.f32 %v1946_v61, %v2052_v40  ;;  %1088 = vmatprep.mubr.f32.mxu1 %v1770_v14  ;;  %v2205_v40 = vpop.permute.xlu1 %736 }
  0xc8   : > { %965 = vmatprep.subr.mxu0 %v689_v50  ;;  %v691_v55 = vsel %vm627_vm14, %v595_v21, %v659_v9  ;;  %v536_v47 = vadd.f32 %v504_v48, %v384_v45 }
  0xc9   : > { %1054 = vmatprep.subr.mxu1 %v691_v55  ;;  %v538_v28 = vadd.f32 %v506_v24, %v386_v27 }
  0xca   : > { %v592_v49 = vadd.f32 %v2076_v30, %v536_v47 }
  0xcb   : > { %v594_v59 = vadd.f32 %v2076_v30, %v538_v28  ;;  %v2209_v37 = vpop.permute.xlu1 %726 }
  0xcc   : > { %vm624_vm0 = vcmp.gt.f32.partialorder %v592_v49, 0.0  ;;  %v656_v29 = vmul.f32 0.01, %v592_v49 }
  0xcd   : > { %vm626_vm1 = vcmp.gt.f32.partialorder %v594_v59, 0.0  ;;  %v658_v41 = vmul.f32 0.01, %v594_v59 }
  0xce   : > { %v688_v25 = vsel %vm624_vm0, %v592_v49, %v656_v29 }
  0xcf   : > { %966 = vmatpush1.msra.mxu0 %v688_v25  ;;  %v690_v60 = vsel %vm626_vm1, %v594_v59, %v658_v41 }
  0xd0   : > { %1055 = vmatpush1.msra.mxu1 %v690_v60  ;;  %1638 = vmatmul.mubr.msk.f32.vlgmr.msra.gmra.mxu0 %vm744_vm15, %v2087_v0 }
  0xd1   : > { %1642 = vmatmul.mubr.msk.f32.vlgmr.msra.gmra.mxu1 %vm744_vm15, %v2087_v0  ;;  %1005 = vmatprep.mubr.f32.mxu0 %v1770_v14 }
  0xd2   : > { %1094 = vmatprep.mubr.f32.mxu1 %v1770_v14 }
  0xd4   : > { %1639 = vmatmul.mubr.msk.f32.gmra.mxu0 %vm744_vm15, %v2108_v35 }
  0xd5   : > { %1643 = vmatmul.mubr.msk.f32.gmra.mxu1 %vm744_vm15, %v2108_v35  ;;  %1011 = vmatprep.mubr.f32.mxu0 %v1770_v14  ;;  %v2207_v35 = vpop.permute.xlu0 %741 }
  0xd6   : > { %1100 = vmatprep.mubr.f32.mxu1 %v1770_v14 }
  0xd8   : > { %1640 = vmatmul.mubr.msk.f32.gmra.mxu0 %vm744_vm15, %v2139_v34 }
  0xd9   : > { %1644 = vmatmul.mubr.msk.f32.gmra.mxu1 %vm744_vm15, %v2139_v34  ;;  %1017 = vmatprep.mubr.f32.mxu0 %v1770_v14  ;;  %v2214_v43 = vpop.permute.xlu0 %731 }
  0xda   : > { %1106 = vmatprep.mubr.f32.mxu1 %v1770_v14 }
  0xdc   : > { %1641 = vmatmul.mubr.msk.f32.gmra.mxu0 %vm744_vm15, %v719_v53 }
  0xdd   : > { %1645 = vmatmul.mubr.msk.f32.gmra.mxu1 %vm744_vm15, %v719_v53  ;;  %1283 = vmatprep.mubr.f32.mxu0 %v1770_v14 }
  0xde   : > { %1354 = vmatprep.mubr.f32.mxu1 %v1770_v14 }
 0x174   : > { %v823_v61 = vpop.f32.mrf.mxu0 }
 0x175   : > { %v2212_v1 = vadd.f32 %v823_v61, %v2209_v37 }
 0x176   : > { %v825_v13 = vpop.f32.mrf.mxu0 }
 0x177   : > { %v2217_v32 = vadd.f32 %v825_v13, %v2209_v37  ;;  %v2226_v34 = vmul.f32 0.01, %v2212_v1  ;;  %vm1113_vm5 = vcmp.gt.f32.partialorder %v2212_v1, 0.0 }
 0x178   : > { %v912_v30 = vpop.f32.mrf.mxu1 }
 0x179   : > { %v829_v0 = vpop.f32.mrf.mxu0  ;;  %v2230_v3 = vadd.f32 %v912_v30, %v2209_v37  ;;  %v2233_v4 = vmul.f32 0.01, %v2217_v32  ;;  %vm1114_vm4 = vcmp.gt.f32.partialorder %v2217_v32, 0.0 }
 0x17a   : > { %v914_v42 = vpop.f32.mrf.mxu1  ;;  %v2220_v33 = vadd.f32 %v829_v0, %v2214_v43 }
 0x17b   : > { %v831_v36 = vpop.f32.mrf.mxu0  ;;  %v2236_v5 = vadd.f32 %v914_v42, %v2209_v37  ;;  %v1147_v29 = vmul.f32 0.01, %v2230_v3  ;;  %v1178_v42 = vsel %vm1114_vm4, %v2217_v32, %v2233_v4 }
 0x17c   : > { %v918_v31 = vpop.f32.mrf.mxu1  ;;  %v2223_v62 = vadd.f32 %v831_v36, %v2214_v43  ;;  %vm1121_vm2 = vcmp.gt.f32.partialorder %v2220_v33, 0.0  ;;  %v1153_v15 = vmul.f32 0.01, %v2220_v33 }
 0x17d   : > { %v2242_v16 = vadd.f32 %v918_v31, %v2214_v43  ;;  %v1148_v28 = vmul.f32 0.01, %v2236_v5  ;;  %vm1116_vm1 = vcmp.gt.f32.partialorder %v2236_v5, 0.0  ;;  %v2283_v31 = vld [vmem:[%s2412_s5] sm:$0x3] }
 0x17e   : > { %v920_v38 = vpop.f32.mrf.mxu1  ;;  %v1154_v63 = vmul.f32 0.01, %v2223_v62  ;;  %vm1122_vm3 = vcmp.gt.f32.partialorder %v2223_v62, 0.0  ;;  %v1185_v13 = vsel %vm1121_vm2, %v2220_v33, %v1153_v15 }
 0x17f   : > { %v921_v54 = vadd.f32 %v920_v38, %v2214_v43  ;;  %v1155_v24 = vmul.f32 0.01, %v2242_v16  ;;  %vm1123_vm0 = vcmp.gt.f32.partialorder %v2242_v16, 0.0  ;;  %v1180_v38 = vsel %vm1116_vm1, %v2236_v5, %v1148_v28 }
 0x180   : > { %v835_v56 = vpop.f32.mrf.mxu0  ;;  %v1186_v25 = vsel %vm1122_vm3, %v2223_v62, %v1154_v63 }
 0x181   : > { %v924_v26 = vpop.f32.mrf.mxu1  ;;  %v836_v57 = vadd.f32 %v835_v56, %v2205_v40  ;;  %v1156_v48 = vmul.f32 0.01, %v921_v54  ;;  %vm1124_vm14 = vcmp.gt.f32.partialorder %v921_v54, 0.0  ;;  %v1187_v0 = vsel %vm1123_vm0, %v2242_v16, %v1155_v24 }
 0x182   : > { %v837_v51 = vpop.f32.mrf.mxu0  ;;  %v925_v44 = vadd.f32 %v924_v26, %v2205_v40  ;;  %v1177_v56 = vsel %vm1113_vm5, %v2212_v1, %v2226_v34 }
 0x183   : > { %v926_v2 = vpop.f32.mrf.mxu1  ;;  %v838_v11 = vadd.f32 %v837_v51, %v2205_v40  ;;  %v1161_v58 = vmul.f32 0.01, %v836_v57  ;;  %vm1129_vm11 = vcmp.gt.f32.partialorder %v836_v57, 0.0  ;;  %v1188_v61 = vsel %vm1124_vm14, %v921_v54, %v1156_v48 }
 0x184   : > { %v841_v12 = vpop.f32.mrf.mxu0  ;;  %v927_v52 = vadd.f32 %v926_v2, %v2205_v40  ;;  %v1163_v8 = vmul.f32 0.01, %v925_v44  ;;  %vm1131_vm13 = vcmp.gt.f32.partialorder %v925_v44, 0.0 }
 0x185   : > { %v842_v39 = vadd.f32 %v841_v12, %v2207_v35  ;;  %v930_v10 = vpop.f32.mrf.mxu1  ;;  %v1162_v19 = vmul.f32 0.01, %v838_v11  ;;  %vm1130_vm6 = vcmp.gt.f32.partialorder %v838_v11, 0.0  ;;  %v1193_v59 = vsel %vm1129_vm11, %v836_v57, %v1161_v58 }
 0x186   : > { %v931_v6 = vadd.f32 %v930_v10, %v2207_v35  ;;  %v843_v53 = vpop.f32.mrf.mxu0  ;;  %v1164_v20 = vmul.f32 0.01, %v927_v52  ;;  %vm1132_vm12 = vcmp.gt.f32.partialorder %v927_v52, 0.0  ;;  %v1195_v41 = vsel %vm1131_vm13, %v925_v44, %v1163_v8 }
 0x187   : > { %v844_v22 = vadd.f32 %v843_v53, %v2207_v35  ;;  %v932_v18 = vpop.f32.mrf.mxu1  ;;  %v1169_v7 = vmul.f32 0.01, %v842_v39  ;;  %vm1137_vm7 = vcmp.gt.f32.partialorder %v842_v39, 0.0  ;;  %v1194_v47 = vsel %vm1130_vm6, %v838_v11, %v1162_v19 }
 0x188   : > { %v933_v46 = vadd.f32 %v932_v18, %v2207_v35  ;;  %v1171_v21 = vmul.f32 0.01, %v931_v6  ;;  %vm1139_vm9 = vcmp.gt.f32.partialorder %v931_v6, 0.0  ;;  %v1196_v49 = vsel %vm1132_vm12, %v927_v52, %v1164_v20 }
 0x189   : > { %v1170_v23 = vmul.f32 0.01, %v844_v22  ;;  %vm1138_vm8 = vcmp.gt.f32.partialorder %v844_v22, 0.0  ;;  %v1201_v27 = vsel %vm1137_vm7, %v842_v39, %v1169_v7  ;;  %vm1115_vm6 = vcmp.gt.f32.partialorder %v2230_v3, 0.0 }
 0x18a   : > { %v1172_v45 = vmul.f32 0.01, %v933_v46  ;;  %vm1140_vm10 = vcmp.gt.f32.partialorder %v933_v46, 0.0  ;;  %v1203_v55 = vsel %vm1139_vm9, %v931_v6, %v1171_v21  ;;  %v1179_v32 = vsel %vm1115_vm6, %v2230_v3, %v1147_v29 }
 0x18b   : > { %v1202_v9 = vsel %vm1138_vm8, %v844_v22, %v1170_v23 }
 0x18c   : > { %1243 = vmatprep.subr.mxu0 %v1202_v9  ;;  %v1204_v50 = vsel %vm1140_vm10, %v933_v46, %v1172_v45 }
 0x18d   : > { %1314 = vmatprep.subr.mxu1 %v1204_v50  ;;  %1244 = vmatpush1.msra.mxu0 %v1201_v27 }
 0x18e   : > { %1315 = vmatpush1.msra.mxu1 %v1203_v55  ;;  %1245 = vmatprep.subr.mxu0 %v1194_v47 }
 0x18f   : > { %1316 = vmatprep.subr.mxu1 %v1196_v49  ;;  %1246 = vmatpush1.msra.mxu0 %v1193_v59 }
 0x190   : > { %v1001_v60 = vpop.f32.mrf.mxu0  ;;  %1317 = vmatpush1.msra.mxu1 %v1195_v41  ;;  %1247 = vmatprep.subr.mxu0 %v1186_v25 }
 0x191   : > { %v1090_v30 = vpop.f32.mrf.mxu1  ;;  %1318 = vmatprep.subr.mxu1 %v1188_v61  ;;  %1248 = vmatpush1.msra.mxu0 %v1185_v13  ;;  %v2302_v34 = vadd.f32 %v1001_v60, %v2209_v37 }
 0x192   : > { %v1003_v36 = vpop.f32.mrf.mxu0  ;;  %1319 = vmatpush1.msra.mxu1 %v1187_v0  ;;  %1249 = vmatprep.subr.mxu0 %v1178_v42  ;;  %v2314_v12 = vadd.f32 %v1090_v30, %v2209_v37 }
 0x193   : > { %v1092_v33 = vpop.f32.mrf.mxu1  ;;  %1320 = vmatprep.subr.mxu1 %v1180_v38  ;;  %1250 = vmatpush1.msra.mxu0 %v1177_v56  ;;  %v2305_v57 = vadd.f32 %v1003_v36, %v2209_v37  ;;  %v2318_v16 = vmul.f32 0.01, %v2302_v34  ;;  %vm1117_vm4 = vcmp.gt.f32.partialorder %v2302_v34, 0.0 }
 0x194   : > { %v1007_v26 = vpop.f32.mrf.mxu0  ;;  %1321 = vmatpush1.msra.mxu1 %v1179_v32  ;;  %1646 = vmatmul.mubr.msk.f32.vlgmr.msra.gmra.mxu0 %vm744_vm15, %v2283_v31  ;;  %v2324_v10 = vadd.f32 %v1092_v33, %v2209_v37  ;;  %v1151_v25 = vmul.f32 0.01, %v2314_v12  ;;  %v1771_v33 = vmov 1983009808  }
 0x195   : > { %v1096_v62 = vpop.f32.mrf.mxu1  ;;  %1647 = vmatmul.mubr.msk.f32.vlgmr.msra.gmra.mxu1 %vm744_vm15, %v2283_v31  ;;  %1425 = vmatprep.mubr.f32.mxu0 %v1770_v14  ;;  %v2308_v3 = vadd.f32 %v1007_v26, %v2214_v43  ;;  %v2321_v39 = vmul.f32 0.01, %v2305_v57  ;;  %vm1118_vm3 = vcmp.gt.f32.partialorder %v2305_v57, 0.0  ;;  %v1181_v38 = vsel %vm1117_vm4, %v2302_v34, %v2318_v16 }
 0x196   : > { %v1009_v51 = vpop.f32.mrf.mxu0  ;;  %1496 = vmatprep.mubr.f32.mxu1 %v1770_v14  ;;  %v1097_v53 = vadd.f32 %v1096_v62, %v2214_v43  ;;  %v1152_v59 = vmul.f32 0.01, %v2324_v10  ;;  %vm1120_vm6 = vcmp.gt.f32.partialorder %v2324_v10, 0.0  ;;  %v1514_v32 = vunpack.c.l.s4 %v1771_v33 }
 0x197   : > { %v1098_v1 = vpop.f32.mrf.mxu1  ;;  %v2311_v5 = vadd.f32 %v1009_v51, %v2214_v43  ;;  %vm1125_vm2 = vcmp.gt.f32.partialorder %v2308_v3, 0.0  ;;  %v1157_v6 = vmul.f32 0.01, %v2308_v3  ;;  %v1182_v42 = vsel %vm1118_vm3, %v2305_v57, %v2321_v39 }
 0x198   : > { %v1013_v2 = vpop.f32.mrf.mxu0  ;;  %v1099_v22 = vadd.f32 %v1098_v1, %v2214_v43  ;;  %vm1127_vm1 = vcmp.gt.f32.partialorder %v1097_v53, 0.0  ;;  %v1184_v36 = vsel %vm1120_vm6, %v2324_v10, %v1152_v59  ;;  %v1515_v26 = vunpack.c.0.s8 %v1514_v32  ;;  %v1214_v1 = vpop.permute.xlu0 %1213 }
 0x199   : > { %v1102_v4 = vpop.f32.mrf.mxu1  ;;  %v1014_v14 = vadd.f32 %v1013_v2, %v2205_v40  ;;  %v1158_v44 = vmul.f32 0.01, %v2311_v5  ;;  %vm1126_vm5 = vcmp.gt.f32.partialorder %v2311_v5, 0.0  ;;  %v1189_v30 = vsel %vm1125_vm2, %v2308_v3, %v1157_v6 }
 0x19a   : > { %v1015_v11 = vpop.f32.mrf.mxu0  ;;  %v1103_v46 = vadd.f32 %v1102_v4, %v2205_v40  ;;  %v1160_v24 = vmul.f32 0.01, %v1099_v22  ;;  %vm1128_vm0 = vcmp.gt.f32.partialorder %v1099_v22, 0.0  ;;  %v1518_v3 = vsub.s32 %v1515_v26, %v1903_v17 }
 0x19b   : > { %v1104_v15 = vpop.f32.mrf.mxu1  ;;  %v1016_v63 = vadd.f32 %v1015_v11, %v2205_v40  ;;  %v1165_v7 = vmul.f32 0.01, %v1014_v14  ;;  %vm1133_vm12 = vcmp.gt.f32.partialorder %v1014_v14, 0.0  ;;  %v1190_v61 = vsel %vm1126_vm5, %v2311_v5, %v1158_v44 }
 0x19c   : > { %v1019_v52 = vpop.f32.mrf.mxu0  ;;  %v1105_v18 = vadd.f32 %v1104_v15, %v2205_v40  ;;  %v1167_v40 = vmul.f32 0.01, %v1103_v46  ;;  %vm1135_vm14 = vcmp.gt.f32.partialorder %v1103_v46, 0.0  ;;  %v1192_v13 = vsel %vm1128_vm0, %v1099_v22, %v1160_v24 }
 0x19d   : > { %v1020_v54 = vadd.f32 %v1019_v52, %v2207_v35  ;;  %v1108_v58 = vpop.f32.mrf.mxu1  ;;  %v1166_v20 = vmul.f32 0.01, %v1016_v63  ;;  %vm1134_vm7 = vcmp.gt.f32.partialorder %v1016_v63, 0.0  ;;  %v1197_v41 = vsel %vm1133_vm12, %v1014_v14, %v1165_v7 }
 0x19e   : > { %v1109_v37 = vadd.f32 %v1108_v58, %v2207_v35  ;;  %v1021_v19 = vpop.f32.mrf.mxu0  ;;  %v1168_v48 = vmul.f32 0.01, %v1105_v18  ;;  %vm1136_vm13 = vcmp.gt.f32.partialorder %v1105_v18, 0.0  ;;  %v1199_v60 = vsel %vm1135_vm14, %v1103_v46, %v1167_v40 }
 0x19f   : > { %v1022_v21 = vadd.f32 %v1021_v19, %v2207_v35  ;;  %v1110_v23 = vpop.f32.mrf.mxu1  ;;  %v1173_v45 = vmul.f32 0.01, %v1020_v54  ;;  %vm1141_vm8 = vcmp.gt.f32.partialorder %v1020_v54, 0.0  ;;  %v1198_v49 = vsel %vm1134_vm7, %v1016_v63, %v1166_v20 }
 0x1a0   : > { %v1111_v43 = vadd.f32 %v1110_v23, %v2207_v35  ;;  %v1175_v8 = vmul.f32 0.01, %v1109_v37  ;;  %vm1143_vm10 = vcmp.gt.f32.partialorder %v1109_v37, 0.0  ;;  %v1159_v35 = vmul.f32 0.01, %v1097_v53 }
 0x1a1   : > { %v1174_v9 = vmul.f32 0.01, %v1022_v21  ;;  %vm1142_vm9 = vcmp.gt.f32.partialorder %v1022_v21, 0.0  ;;  %v1205_v47 = vsel %vm1141_vm8, %v1020_v54, %v1173_v45  ;;  %v1200_v29 = vsel %vm1136_vm13, %v1105_v18, %v1168_v48 }
 0x1a2   : > { %v1176_v50 = vmul.f32 0.01, %v1111_v43  ;;  %vm1144_vm11 = vcmp.gt.f32.partialorder %v1111_v43, 0.0  ;;  %v1207_v28 = vsel %vm1143_vm10, %v1109_v37, %v1175_v8  ;;  %vm1119_vm7 = vcmp.gt.f32.partialorder %v2314_v12, 0.0 }
 0x1a3   : > { %v1206_v27 = vsel %vm1142_vm9, %v1022_v21, %v1174_v9  ;;  %v1191_v0 = vsel %vm1127_vm1, %v1097_v53, %v1159_v35  ;;  %v1183_v56 = vsel %vm1119_vm7, %v2314_v12, %v1151_v25 }
 0x1a4   : > { %1385 = vmatprep.subr.mxu0 %v1206_v27  ;;  %v1208_v55 = vsel %vm1144_vm11, %v1111_v43, %v1176_v50 }
 0x1a5   : > { %1456 = vmatprep.subr.mxu1 %v1208_v55  ;;  %1386 = vmatpush1.msra.mxu0 %v1205_v47 }
 0x1a6   : > { %1457 = vmatpush1.msra.mxu1 %v1207_v28  ;;  %1387 = vmatprep.subr.mxu0 %v1198_v49 }
 0x1a7   : > { %1458 = vmatprep.subr.mxu1 %v1200_v29  ;;  %1388 = vmatpush1.msra.mxu0 %v1197_v41 }
 0x1a8   : > { %1459 = vmatpush1.msra.mxu1 %v1199_v60  ;;  %1389 = vmatprep.subr.mxu0 %v1190_v61 }
 0x1a9   : > { %1460 = vmatprep.subr.mxu1 %v1192_v13  ;;  %1390 = vmatpush1.msra.mxu0 %v1189_v30 }
 0x1aa   : > { %1461 = vmatpush1.msra.mxu1 %v1191_v0  ;;  %1391 = vmatprep.subr.mxu0 %v1182_v42 }
 0x1ab   : > { %1462 = vmatprep.subr.mxu1 %v1184_v36  ;;  %1392 = vmatpush1.msra.mxu0 %v1181_v38 }
 0x1ac   : > { %1463 = vmatpush1.msra.mxu1 %v1183_v56  ;;  %1648 = vmatmul.mubr.msk.f32.vlgmr.msra.gmra.mxu0 %vm744_vm15, %v2283_v31 }
 0x1ad   : > { %1649 = vmatmul.mubr.msk.f32.vlgmr.msra.gmra.mxu1 %vm744_vm15, %v2283_v31 }
 0x254   : > { %v1285_v62 = vpop.f32.mrf.mxu0 }
 0x255   : > { %v1356_v51 = vpop.f32.mrf.mxu1  ;;  %v1286_v34 = vadd.f32 %v1285_v62, %v1214_v1 }
 0x256   : > { %v1287_v57 = vpop.f32.mrf.mxu0  ;;  %v1357_v5 = vadd.f32 %v1356_v51, %v1214_v1 }
 0x257   : > { %v1288_v2 = vadd.f32 %v1287_v57, %v1214_v1  ;;  %v1358_v4 = vpop.f32.mrf.mxu1 }
 0x258   : > { %v1359_v11 = vadd.f32 %v1358_v4, %v1214_v1 }
 0x259   : > { %v1511_v12 = vcombine.low %v1286_v34, %v1288_v2 }
 0x25a   : > { %v1512_v14 = vcombine.low %v1357_v5, %v1359_v11 }
 0x25b   : > { %v1519_v15 = vrot.slane %v1511_v12, %v1518_v3 }
 0x25c   : > { %v1526_v31 = vrot.slane %v1512_v14, %v1518_v3 }
 0x25e   : > { %v1527_v16 = vcombine.low %v1519_v15, %v1526_v31 }
 0x260   : > { %1547 = vst [vmem:[%s272_s14] sm:$0xff] %v1527_v16 }
 0x26c   : > { %v1427_v39 = vpop.f32.mrf.mxu0 }
 0x26d   : > { %v1498_v10 = vpop.f32.mrf.mxu1  ;;  %v1428_v52 = vadd.f32 %v1427_v39, %v1214_v1 }
 0x26e   : > { %v1429_v63 = vpop.f32.mrf.mxu0  ;;  %v1499_v17 = vadd.f32 %v1498_v10, %v1214_v1 }
 0x26f   : > { %v1430_v6 = vadd.f32 %v1429_v63, %v1214_v1  ;;  %v1500_v53 = vpop.f32.mrf.mxu1 }
 0x270   : > { %v1501_v54 = vadd.f32 %v1500_v53, %v1214_v1 }
 0x271   : > { %v1528_v58 = vcombine.low %v1428_v52, %v1430_v6 }
 0x272   : > { %v1529_v44 = vcombine.low %v1499_v17, %v1501_v54 }
 0x273   : > { %v1536_v22 = vrot.slane %v1528_v58, %v1518_v3 }
 0x274   : > { %v1543_v18 = vrot.slane %v1529_v44, %v1518_v3 }
 0x276   : > { %v1544_v37 = vcombine.low %v1536_v22, %v1543_v18 }
 0x278   : > { %1548 = vst [vmem:[%s272_s14 + $0x8] sm:$0xff] %v1544_v37 }
 0x279   : > { %1719 = shalt.err (!%p1716_p3)
}
 0x27a   : > { %s1720_s28 = scalar_lea.hbm %s1562_s19, 256  ;;  %s1724_s13 = scalar_lea.hbm %s2414_s7, 512 }
 0x27b   : > { %p1721_p4 = scmp.ne.s32.totalorder %s1562_s19, %s1720_s28  ;;  %p1725_p9 = scmp.lt.s32.totalorder %s1562_s19, %s2414_s7 }
 0x27c   : > { %p1726_p10 = scmp.lt.s32.totalorder %s1724_s13, %s1720_s28 }
 0x27d   : > { %p1722_p7 = pnand %p1721_p4, %p1851_p5 }
 0x27e   : > { %p1727_p11 = por %p1726_p10, %p1725_p9 }
 0x27f   : > { %p1723_p8 = pneg %p1722_p7 }
 0x281   : > { %p1728_p12 = pnand %p1727_p11, %p1723_p8 }
 0x283   : > { %1731 = shalt.err (!%p1728_p12)
}
 0x284   : > { %1656 = dma.vmem_to_hbm [thread:$0]  (%p1851_p5), %s1565_s16, 256, %s1562_s19, %s1550_s20  }
 0x285 PF: > { %p1662_p13 = scmp.ge.s32.totalorder %s1766_s27, 2  ;;  %s1576_s17 = sand.u32 1, %s1754_s24  }
 0x286   : > { %s1577_s18 = scalar_lea.sflag [#allocation3], %s1576_s17 }
 0x287   : > { %p1659_p0 = pnand %p1662_p13, %p1855_p6 }
 0x289   : > { %p1660_p1 = pneg %p1659_p0 }
 0x28b   : > { %1749 = dma.done.wait (%p1660_p1), %s1577_s18, 256  }
 0x28c   : > { %1751 = vsyncadd (%p1660_p1), %s1577_s18, 4294967040  ;;  %p17_p2 = scmp.ge.s32.totalorder %s1838_s30, 4   ;;  %s2417_s24 = smov %s1758_s25 }
 0x28d   : > { %s2418_s25 = smov %s1762_s26  ;;  %s2419_s26 = smov %s1849_s10 }
 0x28e   : > { %s2420_s27 = smov %s1838_s30  ;;  %19 = sbr.rel (!%p17_p2) target bundleno = 3 (0x3), region = 83 }
 0x293   :  { %1582 = vsyncpa [#allocation3], 1 }
 0x294   :  { %1584 = vsyncpa [#allocation3 + $0x1], 1 }

</bundles_post_ra>
